<compile_context>
chip_gen: v5e
topology: v5e:2x2
jax: 0.10.0
libtpu: 0.0.40
codegen_flags: <defaults>
</compile_context>

<pallas_src>
import math
import functools

import jax
import jax.numpy as jnp
from jax.experimental import pallas as pl
from jax.experimental.pallas import tpu as pltpu

LANE = 128


def _encode_kernel(x_ref, o_ref):
    # Elementwise "encode" of the current tile.  For the base encoder this is
    # the identity map (x encoded as a single-dt spike train equal to x).
    o_ref[...] = x_ref[...]


def _sublane_multiple(dtype):
    itemsize = jnp.dtype(dtype).itemsize
    if itemsize >= 4:
        return 8
    if itemsize == 2:
        return 16
    return 32


@jax.jit
def base_encoder_forward(x):
    """Pallas forward for BaseEncoder-style single-dt encoding.

    x: jnp.ndarray in NCHW layout (any dtype). Returns an array of the same
    shape/dtype (the encoded spikes for one dt).
    """
    orig_shape = x.shape
    dtype = x.dtype
    itemsize = jnp.dtype(dtype).itemsize
    total = math.prod(orig_shape) if orig_shape else 1

    sub = _sublane_multiple(dtype)
    min_block = sub * LANE

    # Pad only when the flattened size is not a multiple of the minimum
    # (sublane, lane) tile.  The common case (image batches / powers of two)
    # takes the zero-pad fast path, avoiding an extra full-array HBM copy.
    pad = (-total) % min_block
    padded = total + pad

    x_flat = x.reshape(-1)
    if pad:
        x_flat = jnp.pad(x_flat, (0, pad))

    # Lane-dense slab: widest last dim (multiple of 128) that divides padded.
    cols = LANE
    for cand in (4096, 2048, 1024, 512, 256):
        if padded % cand == 0:
            cols = cand
            break
    rows = padded // cols
    x2d = x_flat.reshape(rows, cols)

    # ~4 MiB blocks: big enough to sit near HBM roofline, small enough that
    # double-buffered in+out (4 * block) stays well under 32 MiB scoped VMEM
    # on every generation (v5e/v6e/v7x).
    target_block_bytes = 4 * 1024 * 1024
    tile_rows = max(1, target_block_bytes // (cols * itemsize))
    if tile_rows >= rows:
        tile_rows = rows  # single block along rows: full-dim block is legal
    else:
        tile_rows = max(sub, (tile_rows // sub) * sub)  # sublane-aligned

    grid = (pl.cdiv(rows, tile_rows),)  # partial last block is masked by Pallas

    out2d = pl.pallas_call(
        _encode_kernel,
        out_shape=jax.ShapeDtypeStruct((rows, cols), dtype),
        grid_spec=pltpu.PrefetchScalarGridSpec(
            num_scalar_prefetch=0,
            grid=grid,
            in_specs=[pl.BlockSpec((tile_rows, cols), lambda i: (i, 0))],
            out_specs=pl.BlockSpec((tile_rows, cols), lambda i: (i, 0)),
        ),
        compiler_params=pltpu.CompilerParams(
            dimension_semantics=("parallel",),
            vmem_limit_bytes=32 * 1024 * 1024,
        ),
        cost_estimate=pl.CostEstimate(
            flops=0,
            transcendentals=0,
            bytes_accessed=2 * padded * itemsize,
        ),
    )(x2d)

    out_flat = out2d.reshape(-1)
    if pad:
        out_flat = out_flat[:total]
    return out_flat.reshape(orig_shape)


if __name__ == "__main__":
    key = jax.random.PRNGKey(0)
    # Small NCHW input consistent with an image encoder: batch=2, channels=4,
    # spatial 16x16.
    x = jax.random.uniform(key, (2, 4, 16, 16), dtype=jnp.float32)

    out = base_encoder_forward(x)
    out = jax.block_until_ready(out)

    assert out.shape == x.shape
    assert out.dtype == x.dtype
    assert bool(jnp.allclose(out, x))

    # Also exercise a non-power-of-two shape that needs the padded slow path
    # and a multi-block grid.
    x2 = jax.random.normal(jax.random.PRNGKey(0), (3, 5, 17, 19), dtype=jnp.float32)
    out2 = jax.block_until_ready(base_encoder_forward(x2))
    assert out2.shape == x2.shape and bool(jnp.allclose(out2, x2))

    print("KERNEL_OK")
</pallas_src>

<mosaic_0001>
module attributes {stable_mosaic.version = 11 : i64} {
  func.func @_encode_kernel(%arg0: i32, %arg1: memref<1x2048xf32, #tpu.memory_space<vmem>>, %arg2: memref<1x2048xf32, #tpu.memory_space<vmem>>) attributes {dimension_semantics = [#tpu.dimension_semantics<parallel>], iteration_bounds = array<i64: 1>, scalar_prefetch = 0 : i64, scratch_operands = 0 : i64, tpu.core_type = #tpu.core_type<tc>, window_params = [{transform_indices = @transform_0, window_bounds = array<i64: 1, 2048>}, {transform_indices = @transform_1, window_bounds = array<i64: 1, 2048>}]} {
    %c0 = arith.constant 0 : index
    %c0_0 = arith.constant 0 : index
    %0 = vector.load %arg1[%c0, %c0_0] : memref<1x2048xf32, #tpu.memory_space<vmem>>, vector<1x2048xf32>
    %c0_1 = arith.constant 0 : index
    %c0_2 = arith.constant 0 : index
    %1 = vector.load %arg2[%c0_1, %c0_2] : memref<1x2048xf32, #tpu.memory_space<vmem>>, vector<1x2048xf32>
    tpu.vector_store %arg2[%c0_1, %c0_2], %0 {strides = array<i32>} : memref<1x2048xf32, #tpu.memory_space<vmem>>, vector<1x2048xf32>,
    return
  }
  func.func @transform_0(%arg0: i32) -> (i32, i32) {
    %c0_i32 = arith.constant 0 : i32
    %c0_i32_0 = arith.constant 0 : i32
    return %arg0, %c0_i32 : i32, i32
  }
  func.func @transform_1(%arg0: i32) -> (i32, i32) {
    %c0_i32 = arith.constant 0 : i32
    %c0_i32_0 = arith.constant 0 : i32
    return %arg0, %c0_i32 : i32, i32
  }
}

</mosaic_0001>

<bundles_post_ra>
// kernel: base_encoder_forward.1
= control target key start
LH: loop header
LB: loop body
LE: loop exit
PB: predicated region body
PF: predicated region fallthrough
CT: control target
= control target key end

     0   :  { %s38_s0 = inlined_call_operand.vmem [shape: f32[1,2048], index: 0, kind: input, shape index: {}]   ;;  %s39_s1 = inlined_call_operand.vmem [shape: f32[1,2048], index: 1, kind: output, shape index: {}]  }
   0x1   :  { %v8_v0 = vld [vmem:[%s38_s0] sm:$0xff]  ;;  %v9_v1 = vld [vmem:[%s38_s0 + $0x8] sm:$0xff] }
   0x2   :  { %10 = vst [vmem:[%s39_s1] sm:$0xff] %v8_v0 }
   0x3   :  { %11 = vst [vmem:[%s39_s1 + $0x8] sm:$0xff] %v9_v1 }

</bundles_post_ra>
